<compile_context>
chip_gen: v6e
topology: v6e:2x2x1
jax: 0.10.0
libtpu: 0.0.40
codegen_flags: <defaults>
</compile_context>

<pallas_src>
import functools

import jax
import jax.numpy as jnp
from jax.experimental import pallas as pl
from jax.experimental.pallas import tpu as pltpu

LANE = 128      # vreg lane width
SUBLANE = 8     # vreg sublane count (f32)


def _round_up(n, m):
    return ((n + m - 1) // m) * m


def _cdiv(a, b):
    return -(-a // b)


def qnetwork_kernel(x_ref, w1_ref, b1_ref, w2_ref, b2_ref, w3_ref, b3_ref, o_ref):
    """One batch tile of fc1 -> ReLU -> fc2 -> ReLU -> fc3, fully VMEM-resident."""
    cdt = w1_ref.dtype                      # bf16 (default) or f32; MXU accumulates in f32
    x = x_ref[...]                          # (tb, obs_dim) f32

    h1 = jnp.dot(x.astype(cdt), w1_ref[...],
                 preferred_element_type=jnp.float32) + b1_ref[...]
    h1 = jnp.maximum(h1, 0.0)               # f32 VPU (v5e-safe)

    h2 = jnp.dot(h1.astype(cdt), w2_ref[...],
                 preferred_element_type=jnp.float32) + b2_ref[...]
    h2 = jnp.maximum(h2, 0.0)

    q = jnp.dot(h2.astype(cdt), w3_ref[...],
                preferred_element_type=jnp.float32) + b3_ref[...]
    o_ref[...] = q.astype(o_ref.dtype)      # (tb, n_actions) store


def prepare_qnetwork_params(params, weight_dtype=jnp.bfloat16):
    """Pad only the hidden dims to 128 lanes; obs/action dims stay unpadded.

    Padded rows/cols are zero so results are unchanged; biases stay f32.
    Do this once per parameter update, not per forward call."""
    def pad2(a, rows, cols):
        return jnp.pad(a, ((0, rows - a.shape[0]), (0, cols - a.shape[1])))

    w1, b1 = params["w1"], params["b1"]
    w2, b2 = params["w2"], params["b2"]
    w3, b3 = params["w3"], params["b3"]

    obs_dim = w1.shape[0]
    hid_pad = _round_up(w1.shape[1], LANE)
    n_actions = w3.shape[1]

    return {
        "w1": pad2(w1, obs_dim, hid_pad).astype(weight_dtype),
        "b1": pad2(b1, 1, hid_pad).astype(jnp.float32),
        "w2": pad2(w2, hid_pad, hid_pad).astype(weight_dtype),
        "b2": pad2(b2, 1, hid_pad).astype(jnp.float32),
        "w3": pad2(w3, hid_pad, n_actions).astype(weight_dtype),
        "b3": b3.astype(jnp.float32),
    }


@functools.partial(jax.jit, static_argnames=("batch_tile", "min_parallel_batch"))
def qnetwork_forward(x, padded_params, *, batch_tile=1024, min_parallel_batch=64):
    """x: (B, obs_dim). padded_params: output of prepare_qnetwork_params.

    Returns (B, n_actions) float32 Q-values."""
    w1, b1 = padded_params["w1"], padded_params["b1"]
    w2, b2 = padded_params["w2"], padded_params["b2"]
    w3, b3 = padded_params["w3"], padded_params["b3"]

    B, obs_dim = x.shape
    assert obs_dim == w1.shape[0], "obs_dim mismatch with w1"
    n_actions = w3.shape[1]

    if x.dtype != jnp.float32:
        x = x.astype(jnp.float32)

    # --- batch tiling -------------------------------------------------------
    if B < min_parallel_batch:
        # Tiny (inference) path: one full-array block, no padding, no slice.
        n_steps, tb, b_pad = 1, B, B
    else:
        # >= 2 grid steps so the "parallel" axis spans both v7x TensorCores;
        # batch padded only up to n_steps * tb (tb multiple of 8), not to a
        # fixed 256/1024 boundary.
        n_steps = max(_cdiv(B, batch_tile), 2)
        tb = _round_up(_cdiv(B, n_steps), SUBLANE)
        b_pad = n_steps * tb

    xp = x if b_pad == B else jnp.pad(x, ((0, b_pad - B), (0, 0)))

    # Weights/biases: same block every grid step -> DMA'd once, VMEM-resident.
    full = lambda a: pl.BlockSpec(a.shape, lambda i: (0,) * a.ndim)

    out = pl.pallas_call(
        qnetwork_kernel,
        out_shape=jax.ShapeDtypeStruct((b_pad, n_actions), jnp.float32),
        grid=(n_steps,),
        in_specs=[
            pl.BlockSpec((tb, obs_dim), lambda i: (i, 0)),   # x tiled over batch only
            full(w1), full(b1),
            full(w2), full(b2),
            full(w3), full(b3),
        ],
        out_specs=pl.BlockSpec((tb, n_actions), lambda i: (i, 0)),
        compiler_params=pltpu.CompilerParams(
            dimension_semantics=("parallel",),               # shard batch across TCs (v7x)
        ),
    )(xp, w1, b1, w2, b2, w3, b3)

    return out if b_pad == B else out[:B]


def init_qnetwork_params(key, obs_dim, n_actions, hidden=64):
    """Mimics nn.Linear default init (uniform +/- 1/sqrt(fan_in)).
    Weights stored transposed relative to PyTorch: (in_features, out_features)."""
    keys = jax.random.split(key, 6)

    def lin(kw, kb, fan_in, fan_out):
        bound = 1.0 / jnp.sqrt(fan_in)
        w = jax.random.uniform(kw, (fan_in, fan_out), jnp.float32, -bound, bound)
        b = jax.random.uniform(kb, (1, fan_out), jnp.float32, -bound, bound)
        return w, b

    w1, b1 = lin(keys[0], keys[1], obs_dim, hidden)
    w2, b2 = lin(keys[2], keys[3], hidden, hidden)
    w3, b3 = lin(keys[4], keys[5], hidden, n_actions)
    return {"w1": w1, "b1": b1, "w2": w2, "b2": b2, "w3": w3, "b3": b3}


if __name__ == "__main__":
    key = jax.random.PRNGKey(0)
    k_x, k_p, k_x2 = jax.random.split(key, 3)

    batch = 2
    obs_dim = 8      # np.array(observation_space_shape).prod()
    n_actions = 4
    hidden = 64

    x = jax.random.normal(k_x, (batch, obs_dim), dtype=jnp.float32)
    params = init_qnetwork_params(k_p, obs_dim, n_actions, hidden)

    def reference(xx):
        h = jnp.maximum(xx @ params["w1"] + params["b1"], 0.0)
        h = jnp.maximum(h @ params["w2"] + params["b2"], 0.0)
        return h @ params["w3"] + params["b3"]

    # 1) f32 weights: exact path, tiny batch (single block, no pad/slice in graph).
    p_f32 = prepare_qnetwork_params(params, jnp.float32)
    q = qnetwork_forward(x, p_f32)
    jax.block_until_ready(q)
    assert q.shape == (batch, n_actions)
    assert jnp.allclose(q, reference(x), atol=1e-5), "f32 mismatch vs reference"

    # 2) Larger ragged batch exercises the multi-tile grid + minimal batch padding
    #    (B=300 -> 2 tiles of 152 rows).
    x_big = jax.random.normal(k_x2, (300, obs_dim), dtype=jnp.float32)
    q_big = qnetwork_forward(x_big, p_f32)
    jax.block_until_ready(q_big)
    assert q_big.shape == (300, n_actions)
    assert jnp.allclose(q_big, reference(x_big), atol=1e-4), "batched f32 mismatch"

    # 3) Default bf16 weights (native MXU dtype on v6e/v7x), f32 accumulation.
    p_bf16 = prepare_qnetwork_params(params)     # bf16 by default now
    q_bf = qnetwork_forward(x_big, p_bf16)
    jax.block_until_ready(q_bf)
    assert jnp.allclose(q_bf, reference(x_big), atol=5e-2, rtol=5e-2), "bf16 mismatch"

    print("KERNEL_OK")
</pallas_src>

<mosaic_0001>
module attributes {stable_mosaic.version = 11 : i64} {
  func.func @qnetwork_kernel(%arg0: i32, %arg1: memref<2x8xf32, #tpu.memory_space<vmem>>, %arg2: memref<8x128xf32, #tpu.memory_space<vmem>>, %arg3: memref<1x128xf32, #tpu.memory_space<vmem>>, %arg4: memref<128x128xf32, #tpu.memory_space<vmem>>, %arg5: memref<1x128xf32, #tpu.memory_space<vmem>>, %arg6: memref<128x4xf32, #tpu.memory_space<vmem>>, %arg7: memref<1x4xf32, #tpu.memory_space<vmem>>, %arg8: memref<2x4xf32, #tpu.memory_space<vmem>>) attributes {dimension_semantics = [#tpu.dimension_semantics<parallel>], iteration_bounds = array<i64: 1>, scalar_prefetch = 0 : i64, scratch_operands = 0 : i64, tpu.core_type = #tpu.core_type<tc>, window_params = [{transform_indices = @transform_0, window_bounds = array<i64: 2, 8>}, {pipeline_mode = #tpu.pipeline_mode<synchronous>, transform_indices = @transform_1, window_bounds = array<i64: 8, 128>}, {pipeline_mode = #tpu.pipeline_mode<synchronous>, transform_indices = @transform_2, window_bounds = array<i64: 1, 128>}, {pipeline_mode = #tpu.pipeline_mode<synchronous>, transform_indices = @transform_3, window_bounds = array<i64: 128, 128>}, {pipeline_mode = #tpu.pipeline_mode<synchronous>, transform_indices = @transform_4, window_bounds = array<i64: 1, 128>}, {pipeline_mode = #tpu.pipeline_mode<synchronous>, transform_indices = @transform_5, window_bounds = array<i64: 128, 4>}, {pipeline_mode = #tpu.pipeline_mode<synchronous>, transform_indices = @transform_6, window_bounds = array<i64: 1, 4>}, {transform_indices = @transform_7, window_bounds = array<i64: 2, 4>}]} {
    %c0 = arith.constant 0 : index
    %c0_0 = arith.constant 0 : index
    %0 = vector.load %arg1[%c0, %c0_0] : memref<2x8xf32, #tpu.memory_space<vmem>>, vector<2x8xf32>
    %c0_1 = arith.constant 0 : index
    %c0_2 = arith.constant 0 : index
    %1 = vector.load %arg2[%c0_1, %c0_2] : memref<8x128xf32, #tpu.memory_space<vmem>>, vector<8x128xf32>
    %cst = arith.constant dense<0.000000e+00> : vector<2x128xf32>
    %2 = tpu.matmul %0, %1, %cst {dimension_numbers = #tpu.dot_dimension_numbers<[1], [0], [0], [1], [0, 0, 1, 1], [], []>} : vector<2x8xf32>, vector<8x128xf32>, vector<2x128xf32> -> vector<2x128xf32>
    %c0_3 = arith.constant 0 : index
    %c0_4 = arith.constant 0 : index
    %3 = vector.load %arg3[%c0_3, %c0_4] : memref<1x128xf32, #tpu.memory_space<vmem>>, vector<1x128xf32>
    %4 = vector.broadcast %3 : vector<1x128xf32> to vector<2x128xf32>
    %5 = arith.addf %2, %4 : vector<2x128xf32>
    %cst_5 = arith.constant 0.000000e+00 : f32
    %6 = vector.broadcast %cst_5 : f32 to vector<2x128xf32>
    %7 = arith.maximumf %5, %6 : vector<2x128xf32>
    %c0_6 = arith.constant 0 : index
    %c0_7 = arith.constant 0 : index
    %8 = vector.load %arg4[%c0_6, %c0_7] : memref<128x128xf32, #tpu.memory_space<vmem>>, vector<128x128xf32>
    %cst_8 = arith.constant dense<0.000000e+00> : vector<2x128xf32>
    %9 = tpu.matmul %7, %8, %cst_8 {dimension_numbers = #tpu.dot_dimension_numbers<[1], [0], [0], [1], [0, 0, 1, 1], [], []>} : vector<2x128xf32>, vector<128x128xf32>, vector<2x128xf32> -> vector<2x128xf32>
    %c0_9 = arith.constant 0 : index
    %c0_10 = arith.constant 0 : index
    %10 = vector.load %arg5[%c0_9, %c0_10] : memref<1x128xf32, #tpu.memory_space<vmem>>, vector<1x128xf32>
    %11 = vector.broadcast %10 : vector<1x128xf32> to vector<2x128xf32>
    %12 = arith.addf %9, %11 : vector<2x128xf32>
    %cst_11 = arith.constant 0.000000e+00 : f32
    %13 = vector.broadcast %cst_11 : f32 to vector<2x128xf32>
    %14 = arith.maximumf %12, %13 : vector<2x128xf32>
    %c0_12 = arith.constant 0 : index
    %c0_13 = arith.constant 0 : index
    %15 = vector.load %arg6[%c0_12, %c0_13] : memref<128x4xf32, #tpu.memory_space<vmem>>, vector<128x4xf32>
    %cst_14 = arith.constant dense<0.000000e+00> : vector<2x4xf32>
    %16 = tpu.matmul %14, %15, %cst_14 {dimension_numbers = #tpu.dot_dimension_numbers<[1], [0], [0], [1], [0, 0, 1, 1], [], []>} : vector<2x128xf32>, vector<128x4xf32>, vector<2x4xf32> -> vector<2x4xf32>
    %c0_15 = arith.constant 0 : index
    %c0_16 = arith.constant 0 : index
    %17 = vector.load %arg7[%c0_15, %c0_16] : memref<1x4xf32, #tpu.memory_space<vmem>>, vector<1x4xf32>
    %18 = vector.broadcast %17 : vector<1x4xf32> to vector<2x4xf32>
    %19 = arith.addf %16, %18 : vector<2x4xf32>
    %c0_17 = arith.constant 0 : index
    %c0_18 = arith.constant 0 : index
    %20 = vector.load %arg8[%c0_17, %c0_18] : memref<2x4xf32, #tpu.memory_space<vmem>>, vector<2x4xf32>
    tpu.vector_store %arg8[%c0_17, %c0_18], %19 {strides = array<i32>} : memref<2x4xf32, #tpu.memory_space<vmem>>, vector<2x4xf32>,
    return
  }
  func.func @transform_0(%arg0: i32) -> (i32, i32) {
    %c0_i32 = arith.constant 0 : i32
    %c0_i32_0 = arith.constant 0 : i32
    return %arg0, %c0_i32 : i32, i32
  }
  func.func @transform_1(%arg0: i32) -> (i32, i32) {
    %c0_i32 = arith.constant 0 : i32
    %c0_i32_0 = arith.constant 0 : i32
    %c0_i32_1 = arith.constant 0 : i32
    return %c0_i32, %c0_i32_0 : i32, i32
  }
  func.func @transform_2(%arg0: i32) -> (i32, i32) {
    %c0_i32 = arith.constant 0 : i32
    %c0_i32_0 = arith.constant 0 : i32
    %c0_i32_1 = arith.constant 0 : i32
    return %c0_i32, %c0_i32_0 : i32, i32
  }
  func.func @transform_3(%arg0: i32) -> (i32, i32) {
    %c0_i32 = arith.constant 0 : i32
    %c0_i32_0 = arith.constant 0 : i32
    %c0_i32_1 = arith.constant 0 : i32
    return %c0_i32, %c0_i32_0 : i32, i32
  }
  func.func @transform_4(%arg0: i32) -> (i32, i32) {
    %c0_i32 = arith.constant 0 : i32
    %c0_i32_0 = arith.constant 0 : i32
    %c0_i32_1 = arith.constant 0 : i32
    return %c0_i32, %c0_i32_0 : i32, i32
  }
  func.func @transform_5(%arg0: i32) -> (i32, i32) {
    %c0_i32 = arith.constant 0 : i32
    %c0_i32_0 = arith.constant 0 : i32
    %c0_i32_1 = arith.constant 0 : i32
    return %c0_i32, %c0_i32_0 : i32, i32
  }
  func.func @transform_6(%arg0: i32) -> (i32, i32) {
    %c0_i32 = arith.constant 0 : i32
    %c0_i32_0 = arith.constant 0 : i32
    %c0_i32_1 = arith.constant 0 : i32
    return %c0_i32, %c0_i32_0 : i32, i32
  }
  func.func @transform_7(%arg0: i32) -> (i32, i32) {
    %c0_i32 = arith.constant 0 : i32
    %c0_i32_0 = arith.constant 0 : i32
    return %arg0, %c0_i32 : i32, i32
  }
}

</mosaic_0001>

<bundles_post_ra>
// kernel: qnetwork_forward.1
= control target key start
LH: loop header
LB: loop body
LE: loop exit
PB: predicated region body
PF: predicated region fallthrough
CT: control target
= control target key end

     0   :  { %12 = vsyncpa [#allocation3], 0  ;;  %s757_s0 = inlined_call_operand.vmem [shape: f32[2,8], index: 0, kind: input, shape index: {}]   ;;  %s758_s1 = inlined_call_operand.vmem [shape: f32[8,128], index: 1, kind: input, shape index: {}]   ;;  %s759_s2 = inlined_call_operand.hbm [shape: f32[1,128], index: 2, kind: input, shape index: {}]   ;;  %s760_s3 = inlined_call_operand.vmem [shape: f32[128,128], index: 3, kind: input, shape index: {}]   ;;  %s761_s4 = inlined_call_operand.hbm [shape: f32[1,128], index: 4, kind: input, shape index: {}]   ;;  %s762_s5 = inlined_call_operand.vmem [shape: f32[128,4], index: 5, kind: input, shape index: {}]   ;;  %s763_s6 = inlined_call_operand.hbm [shape: f32[1,4], index: 6, kind: input, shape index: {}]   ;;  %s764_s7 = inlined_call_operand.hbm [shape: f32[2,4], index: 7, kind: output, shape index: {}]  }
   0x1   :  { %13 = vsyncpa [#allocation6], 0 }
   0x2   :  { %14 = vsyncpa [#allocation4], 0  ;;  %s558_s24 = smov [#allocation5]   ;;  %s559_s26 = smov [#allocation2]  }
   0x3   :  { %s37_s25 = sshll.u32 %s558_s24, 4  ;;  %s25_s27 = sshll.u32 %s559_s26, 4  ;;  %s38_s25 = int_to_ptr.vmem [resolvable:$true] %s37_s25  ;;  %s26_s27 = int_to_ptr.vmem [resolvable:$true] %s25_s27 }
   0x4   :  { %s480_s28 = scalar_lea.vmem %s38_s25, 16  ;;  %s484_s29 = scalar_lea.vmem %s38_s25, 32 }
   0x5   :  { %p481_p0 = scmp.ne.s32.totalorder %s38_s25, %s480_s28  ;;  %p485_p1 = scmp.lt.s32.totalorder %s38_s25, %s38_s25 }
   0x6   :  { %p486_p2 = scmp.lt.s32.totalorder %s484_s29, %s480_s28 }
   0x8   :  { %p487_p3 = por %p486_p2, %p485_p1 }
   0xa   :  { %p488_p4 = pnand %p487_p3, %p481_p0 }
   0xc   :  { %491 = shalt.err (!%p488_p4)
}
   0xd   :  { %40 = dma.hbm_to_vmem [thread:$0]  %s761_s4, 16, %s38_s25, [#allocation6]  }
   0xe   :  { %s500_s9 = scalar_lea.vmem %s26_s27, 16  ;;  %s504_s10 = scalar_lea.vmem %s26_s27, 32 }
   0xf   :  { %p501_p5 = scmp.ne.s32.totalorder %s26_s27, %s500_s9  ;;  %p505_p6 = scmp.lt.s32.totalorder %s26_s27, %s26_s27 }
  0x10   :  { %p506_p7 = scmp.lt.s32.totalorder %s504_s10, %s500_s9 }
  0x12   :  { %p507_p8 = por %p506_p7, %p505_p6 }
  0x14   :  { %p508_p9 = pnand %p507_p8, %p501_p5 }
  0x16   :  { %511 = shalt.err (!%p508_p9)
}
  0x17   :  { %28 = dma.hbm_to_vmem [thread:$0]  %s759_s2, 16, %s26_s27, [#allocation3]  }
  0x18   :  { %s560_s13 = smov [#allocation7]  }
  0x19   :  { %s49_s14 = sshll.u32 %s560_s13, 4  ;;  %s50_s14 = int_to_ptr.vmem [resolvable:$true] %s49_s14 }
  0x1a   :  { %s520_s15 = scalar_lea.vmem %s50_s14, 16  ;;  %s524_s16 = scalar_lea.vmem %s50_s14, 32 }
  0x1b   :  { %p521_p10 = scmp.ne.s32.totalorder %s50_s14, %s520_s15  ;;  %p525_p11 = scmp.lt.s32.totalorder %s50_s14, %s50_s14 }
  0x1c   :  { %p526_p12 = scmp.lt.s32.totalorder %s524_s16, %s520_s15 }
  0x1e   :  { %p527_p13 = por %p526_p12, %p525_p11 }
  0x20   :  { %p528_p0 = pnand %p527_p13, %p521_p10 }
  0x22   :  { %531 = shalt.err (!%p528_p0)
}
  0x23   :  { %52 = dma.hbm_to_vmem [thread:$0]  %s763_s6, 16, %s50_s14, [#allocation6]  }
  0x24   :  { %552 = dma.done.wait [#allocation3], 16  }
  0x25   :  { %553 = vsyncadd [#allocation3], 4294967280 }
  0x26   :  { %554 = dma.done.wait [#allocation6], 32  }
  0x27   :  { %555 = vsyncadd [#allocation6], 4294967264  ;;  %v561_v0 = vmov 0.0   ;;  %vm562_vm0 = vmmov 0   ;;  %vm71_vm1 = vcmask 64512   ;;  %v63_v1 = vld [vmem:[%s758_s1] sm:$0xff] }
  0x28   :  { %391 = vmatprep.subr.mxu0 %v561_v0  ;;  %393 = vmatprep.mubr.msk.f32.mxu0 %vm562_vm0, %v561_v0  ;;  %v62_v2 = vld [vmem:[%s757_s0] sm:$0x3]  ;;  %v161_v3 = vld [vmem:[%s760_s3 + $0x78] sm:$0xff]  ;;  %v160_v4 = vld [vmem:[%s760_s3 + $0x70] sm:$0xff]  ;;  %s563_s1 = smov [#allocation8]   ;;  %vm333_vm2 = vcmask 25600  }
  0x29   :  { %396 = vmatprep.subr.mxu1 %v561_v0  ;;  %428 = vmatprep.mubr.msk.f32.mxu1 %vm562_vm0, %v561_v0  ;;  %v159_v5 = vld [vmem:[%s760_s3 + $0x68] sm:$0xff]  ;;  %v158_v6 = vld [vmem:[%s760_s3 + $0x60] sm:$0xff]  ;;  %v157_v7 = vld [vmem:[%s760_s3 + $0x58] sm:$0xff]  ;;  %s341_s26 = sshll.u32 %s563_s1, 4  ;;  %s342_s26 = int_to_ptr.vmem [resolvable:$true] %s341_s26 }
  0x2a   :  { %392 = vmatpush3.msra.mxu0 %v63_v1  ;;  %397 = vmatpush3.msra.mxu1 %v161_v3  ;;  %v156_v8 = vld [vmem:[%s760_s3 + $0x50] sm:$0xff]  ;;  %v155_v9 = vld [vmem:[%s760_s3 + $0x48] sm:$0xff]  ;;  %v154_v10 = vld [vmem:[%s760_s3 + $0x40] sm:$0xff]  ;;  %s532_s27 = scalar_lea.vmem %s342_s26, 32  ;;  %p537_p2 = scmp.lt.s32.totalorder %s342_s26, %s342_s26 }
  0x2b   :  { %394 = vmatmul.mubr.msk.f32.vlgmr.msra.gmra.mxu0 %vm71_vm1, %v62_v2  ;;  %398 = vmatprep.subr.mxu1 %v561_v0  ;;  %v153_v11 = vld [vmem:[%s760_s3 + $0x38] sm:$0xff]  ;;  %v152_v12 = vld [vmem:[%s760_s3 + $0x30] sm:$0xff]  ;;  %v151_v13 = vld [vmem:[%s760_s3 + $0x28] sm:$0xff]  ;;  %p533_p1 = scmp.ne.s32.totalorder %s342_s26, %s532_s27  ;;  %p538_p3 = scmp.lt.s32.totalorder %s532_s27, %s532_s27 }
  0x2c   :  { %399 = vmatpush3.msra.mxu1 %v160_v4  ;;  %431 = vmatprep.subr.mxu0 %v561_v0  ;;  %v150_v14 = vld [vmem:[%s760_s3 + $0x20] sm:$0xff]  ;;  %v149_v15 = vld [vmem:[%s760_s3 + $0x18] sm:$0xff]  ;;  %v148_v16 = vld [vmem:[%s760_s3 + $0x10] sm:$0xff] }
  0x2d   :  { %400 = vmatprep.subr.mxu1 %v561_v0  ;;  %463 = vmatprep.mubr.msk.f32.mxu0 %vm562_vm0, %v561_v0  ;;  %v147_v17 = vld [vmem:[%s760_s3 + $0x8] sm:$0xff]  ;;  %v146_v18 = vld [vmem:[%s760_s3] sm:$0xff]  ;;  %v255_v19 = vld [vmem:[%s762_s5 + $0x78] sm:$0xff]  ;;  %p539_p4 = por %p538_p3, %p537_p2 }
  0x2e   :  { %401 = vmatpush3.msra.mxu1 %v159_v5  ;;  %v254_v20 = vld [vmem:[%s762_s5 + $0x70] sm:$0xff]  ;;  %432 = vmatpush3.msra.mxu0 %v255_v19  ;;  %v253_v21 = vld [vmem:[%s762_s5 + $0x68] sm:$0xff]  ;;  %v252_v22 = vld [vmem:[%s762_s5 + $0x60] sm:$0xff] }
  0x2f   :  { %402 = vmatprep.subr.mxu1 %v561_v0  ;;  %433 = vmatprep.subr.mxu0 %v561_v0  ;;  %v251_v23 = vld [vmem:[%s762_s5 + $0x58] sm:$0xff]  ;;  %v250_v24 = vld [vmem:[%s762_s5 + $0x50] sm:$0xff]  ;;  %v249_v25 = vld [vmem:[%s762_s5 + $0x48] sm:$0xff]  ;;  %p540_p5 = pnand %p539_p4, %p533_p1 }
  0x30   :  { %403 = vmatpush3.msra.mxu1 %v158_v6  ;;  %434 = vmatpush3.msra.mxu0 %v254_v20  ;;  %v248_v26 = vld [vmem:[%s762_s5 + $0x40] sm:$0xff]  ;;  %v247_v27 = vld [vmem:[%s762_s5 + $0x38] sm:$0xff]  ;;  %v246_v28 = vld [vmem:[%s762_s5 + $0x30] sm:$0xff] }
  0x31   :  { %404 = vmatprep.subr.mxu1 %v561_v0  ;;  %435 = vmatprep.subr.mxu0 %v561_v0  ;;  %v245_v29 = vld [vmem:[%s762_s5 + $0x28] sm:$0xff]  ;;  %v244_v30 = vld [vmem:[%s762_s5 + $0x20] sm:$0xff]  ;;  %v243_v31 = vld [vmem:[%s762_s5 + $0x18] sm:$0xff] }
  0x32   :  { %405 = vmatpush3.msra.mxu1 %v157_v7  ;;  %436 = vmatpush3.msra.mxu0 %v253_v21  ;;  %v351_v32 = vld [vmem:[#allocation2] ss:$0 sm:$0xff]  ;;  %v242_v37 = vld [vmem:[%s762_s5 + $0x10] sm:$0xff]  ;;  %v241_v38 = vld [vmem:[%s762_s5 + $0x8] sm:$0xff] }
  0x33   :  { %406 = vmatprep.subr.mxu1 %v561_v0  ;;  %437 = vmatprep.subr.mxu0 %v561_v0  ;;  %v240_v39 = vld [vmem:[%s762_s5] sm:$0xff] }
  0x34   :  { %407 = vmatpush3.msra.mxu1 %v156_v8  ;;  %438 = vmatpush3.msra.mxu0 %v252_v22  ;;  %v353_v40 = vld [vmem:[#allocation5] ss:$0 sm:$0xff]  ;;  %v354_v45 = vld [vmem:[#allocation7] ss:$0 sm:$0xff] }
  0x35   :  { %408 = vmatprep.subr.mxu1 %v561_v0  ;;  %439 = vmatprep.subr.mxu0 %v561_v0 }
  0x36   :  { %409 = vmatpush3.msra.mxu1 %v155_v9  ;;  %440 = vmatpush3.msra.mxu0 %v251_v23 }
  0x37   :  { %410 = vmatprep.subr.mxu1 %v561_v0  ;;  %441 = vmatprep.subr.mxu0 %v561_v0 }
  0x38   :  { %411 = vmatpush3.msra.mxu1 %v154_v10  ;;  %442 = vmatpush3.msra.mxu0 %v250_v24 }
  0x39   :  { %412 = vmatprep.subr.mxu1 %v561_v0  ;;  %443 = vmatprep.subr.mxu0 %v561_v0 }
  0x3a   :  { %413 = vmatpush3.msra.mxu1 %v153_v11  ;;  %444 = vmatpush3.msra.mxu0 %v249_v25 }
  0x3b   :  { %414 = vmatprep.subr.mxu1 %v561_v0  ;;  %445 = vmatprep.subr.mxu0 %v561_v0 }
  0x3c   :  { %415 = vmatpush3.msra.mxu1 %v152_v12  ;;  %446 = vmatpush3.msra.mxu0 %v248_v26 }
  0x3d   :  { %416 = vmatprep.subr.mxu1 %v561_v0  ;;  %447 = vmatprep.subr.mxu0 %v561_v0 }
  0x3e   :  { %417 = vmatpush3.msra.mxu1 %v151_v13  ;;  %448 = vmatpush3.msra.mxu0 %v247_v27 }
  0x3f   :  { %418 = vmatprep.subr.mxu1 %v561_v0  ;;  %449 = vmatprep.subr.mxu0 %v561_v0 }
  0x40   :  { %419 = vmatpush3.msra.mxu1 %v150_v14  ;;  %450 = vmatpush3.msra.mxu0 %v246_v28 }
  0x41   :  { %420 = vmatprep.subr.mxu1 %v561_v0  ;;  %451 = vmatprep.subr.mxu0 %v561_v0 }
  0x42   :  { %421 = vmatpush3.msra.mxu1 %v149_v15  ;;  %452 = vmatpush3.msra.mxu0 %v245_v29 }
  0x43   :  { %422 = vmatprep.subr.mxu1 %v561_v0  ;;  %453 = vmatprep.subr.mxu0 %v561_v0 }
  0x44   :  { %423 = vmatpush3.msra.mxu1 %v148_v16  ;;  %454 = vmatpush3.msra.mxu0 %v244_v30 }
  0x45   :  { %424 = vmatprep.subr.mxu1 %v561_v0  ;;  %455 = vmatprep.subr.mxu0 %v561_v0 }
  0x46   :  { %425 = vmatpush3.msra.mxu1 %v147_v17  ;;  %456 = vmatpush3.msra.mxu0 %v243_v31 }
  0x47   :  { %426 = vmatprep.subr.mxu1 %v561_v0  ;;  %457 = vmatprep.subr.mxu0 %v561_v0 }
  0x48   :  { %427 = vmatpush3.msra.mxu1 %v146_v18  ;;  %458 = vmatpush3.msra.mxu0 %v242_v37 }
  0x49   :  { %459 = vmatprep.subr.mxu0 %v561_v0 }
  0x4a   :  { %460 = vmatpush3.msra.mxu0 %v241_v38 }
  0x4b   :  { %461 = vmatprep.subr.mxu0 %v561_v0 }
  0x4c   :  { %462 = vmatpush3.msra.mxu0 %v240_v39 }
  0xeb   :  { %v141_v33 = vpop.f32.mrf.mxu0 }
  0xec   :  { %v142_v34 = vadd.f32 %v351_v32, %v141_v33 }
  0xed   :  { %v395_v35 = vpop.f32.mrf.mxu0 }
  0xee   :  { %v145_v36 = vmax.f32 %v142_v34, 0.0 }
  0xf0   :  { %429 = vmatmul.mubr.f32.vlgmr.msra.gmra.mxu1 %v145_v36 }
 0x1b0   :  { %v235_v41 = vpop.f32.mrf.mxu1 }
 0x1b1   :  { %v236_v42 = vadd.f32 %v353_v40, %v235_v41 }
 0x1b2   :  { %v430_v43 = vpop.f32.mrf.mxu1 }
 0x1b3   :  { %v239_v44 = vmax.f32 %v236_v42, 0.0 }
 0x1b5   :  { %464 = vmatmul.mubr.f32.vlgmr.msra.gmra.mxu0 %v239_v44 }
 0x275   :  { %v329_v46 = vpop.f32.mrf.mxu0 }
 0x276   :  { %v330_v47 = vadd.f32 %v354_v45, %v329_v46 }
 0x277   :  { %v465_v48 = vpop.f32.mrf.mxu0 }
 0x278   :  { %334 = vst.msk [vmem:[#allocation8] sm:$0x3] %vm333_vm2, %v330_v47 }
 0x279   :  { %543 = shalt.err (!%p540_p5)
}
 0x27a   :  { %344 = dma.vmem_to_hbm [thread:$0]  %s342_s26, 32, %s764_s7, [#allocation4]  }
 0x27b   :  { %556 = dma.done.wait [#allocation4], 32  }
 0x27c   :  { %557 = vsyncadd [#allocation4], 4294967264 }
 0x27d   :  { %348 = vsyncpa [#allocation3], 1 }
 0x27e   :  { %349 = vsyncpa [#allocation6], 1 }
 0x27f   :  { %350 = vsyncpa [#allocation4], 1 }

</bundles_post_ra>
